<compile_context>
chip_gen: v7x
topology: tpu7x:2x2x1
jax: 0.10.0
libtpu: 0.0.40
codegen_flags: <defaults>
</compile_context>

<pallas_src>
import jax
import jax.numpy as jnp
from jax.experimental import pallas as pl
from jax.experimental.pallas import tpu as pltpu


H1 = 120
H2 = 84
_LANE = 128


def _round_up(n, m):
    return ((n + m - 1) // m) * m


def _pad2d(a, rows, cols):
    return jnp.pad(a, ((0, rows - a.shape[0]), (0, cols - a.shape[1])))


def dqn_mlp_kernel(x_ref, w1_ref, b1_ref, w2_ref, b2_ref, w3_ref, b3_ref, o_ref):
    """Fused 3-layer MLP for one batch tile: relu(relu(x@W1+b1)@W2+b2)@W3+b3."""
    x = x_ref[...]
    # Matmuls run in the weights' (bf16) dtype on the MXU with f32 accumulation;
    # bias add + ReLU stay in f32 on the VPU (v5e has no bf16 VPU/EUP).
    h1 = jnp.dot(x, w1_ref[...], preferred_element_type=jnp.float32) + b1_ref[...]
    h1 = jnp.maximum(h1, 0.0).astype(w2_ref.dtype)
    h2 = jnp.dot(h1, w2_ref[...], preferred_element_type=jnp.float32) + b2_ref[...]
    h2 = jnp.maximum(h2, 0.0).astype(w3_ref.dtype)
    out = jnp.dot(h2, w3_ref[...], preferred_element_type=jnp.float32) + b3_ref[...]
    o_ref[...] = out.astype(o_ref.dtype)


def _choose_batch_tile(B, batch_tile):
    # Keep the tile a multiple of 128 rows (MXU-height friendly, valid sublane
    # packing for bf16/f32) and no larger than the 128-rounded batch itself.
    bt = _round_up(min(max(batch_tile, _LANE), _round_up(B, _LANE)), _LANE)
    # v7x has two TensorCores that split "parallel" grid axes: prefer >= 2 grid
    # steps when the batch allows it so neither core sits idle.
    if B <= bt and bt > _LANE:
        bt = max(_LANE, _round_up(B, 2 * _LANE) // 2)
    return bt


def dqn_forward(x, params, *, batch_tile=256, compute_dtype=jnp.bfloat16):
    """DQNAgentClassical forward pass via a single fused Pallas kernel.

    x: [B, obs] float32
    params: dict with w1 [obs,120], b1 [1,120], w2 [120,84], b2 [1,84],
            w3 [84,A], b3 [1,A]  (weights stored [in, out]).
    Returns [B, A] float32 Q-values.
    """
    B, obs = x.shape
    num_actions = params["w3"].shape[1]

    # ---- pad feature dims to 128-lane multiples (exact; sliced off below) ----
    h1p, h2p, ap = (_round_up(d, _LANE) for d in (H1, H2, num_actions))
    w1 = _pad2d(params["w1"], obs, h1p).astype(compute_dtype)
    w2 = _pad2d(params["w2"], h1p, h2p).astype(compute_dtype)
    w3 = _pad2d(params["w3"], h2p, ap).astype(compute_dtype)
    b1 = _pad2d(params["b1"], 1, h1p).astype(jnp.float32)
    b2 = _pad2d(params["b2"], 1, h2p).astype(jnp.float32)
    b3 = _pad2d(params["b3"], 1, ap).astype(jnp.float32)

    # ---- pick a batch tile and pad the batch (no divisibility assert) ----
    bt = _choose_batch_tile(B, batch_tile)
    b_pad = _round_up(B, bt)
    xp = x if b_pad == B else jnp.pad(x, ((0, b_pad - B), (0, 0)))
    xp = xp.astype(compute_dtype)

    grid = (b_pad // bt,)

    # Weights / biases: full-array blocks with a constant index_map ->
    # VMEM-resident, not re-fetched across grid steps.
    const = lambda arr: pl.BlockSpec(arr.shape, lambda i: (0, 0))

    out = pl.pallas_call(
        dqn_mlp_kernel,
        out_shape=jax.ShapeDtypeStruct((b_pad, ap), jnp.float32),
        grid_spec=pltpu.PrefetchScalarGridSpec(
            num_scalar_prefetch=0,
            grid=grid,
            in_specs=[
                pl.BlockSpec((bt, obs), lambda i: (i, 0)),
                const(w1), const(b1),
                const(w2), const(b2),
                const(w3), const(b3),
            ],
            out_specs=pl.BlockSpec((bt, ap), lambda i: (i, 0)),
        ),
        compiler_params=pltpu.CompilerParams(
            # Batch tiles are independent -> shard across v7x's 2 TensorCores.
            dimension_semantics=("parallel",),
        ),
    )(xp, w1, b1, w2, b2, w3, b3)

    return out[:B, :num_actions]


def init_params(key, observation_size, num_actions):
    """Deterministic init matching nn.Linear's default U(-1/sqrt(fan_in), 1/sqrt(fan_in))."""
    dims = [(observation_size, H1), (H1, H2), (H2, num_actions)]
    params = {}
    for idx, (fan_in, fan_out) in enumerate(dims, start=1):
        key, kw, kb = jax.random.split(key, 3)
        bound = 1.0 / jnp.sqrt(jnp.float32(fan_in))
        params[f"w{idx}"] = jax.random.uniform(
            kw, (fan_in, fan_out), jnp.float32, minval=-bound, maxval=bound
        )
        params[f"b{idx}"] = jax.random.uniform(
            kb, (1, fan_out), jnp.float32, minval=-bound, maxval=bound
        )
    return params


def reference_forward(x, params, compute_dtype=jnp.float32):
    """Pure-JAX reference matching the PyTorch forward.

    With compute_dtype=bf16 it applies the same input/weight quantization the
    kernel uses (f32 accumulation), giving a tight comparison target.
    """
    cast = lambda a: a.astype(compute_dtype).astype(jnp.float32)
    h1 = jnp.maximum(cast(x) @ cast(params["w1"]) + params["b1"], 0.0)
    h2 = jnp.maximum(cast(h1) @ cast(params["w2"]) + params["b2"], 0.0)
    return cast(h2) @ cast(params["w3"]) + params["b3"]


if __name__ == "__main__":
    observation_size = 16
    num_actions = 4
    batch = 6  # deliberately NOT a multiple of the tile: wrapper pads internally

    key = jax.random.PRNGKey(0)
    key, kx = jax.random.split(key)
    x = jax.random.normal(kx, (batch, observation_size), jnp.float32)
    params = init_params(key, observation_size, num_actions)

    out = jax.block_until_ready(dqn_forward(x, params))
    assert out.shape == (batch, num_actions)
    assert out.dtype == jnp.float32

    # Tight check vs a reference using the same bf16 input/weight quantization.
    ref_q = reference_forward(x, params, compute_dtype=jnp.bfloat16)
    assert jnp.allclose(out, ref_q, atol=1e-3, rtol=1e-3), "mismatch vs bf16-matched reference"

    # Loose check vs the exact f32 PyTorch-equivalent forward (bf16 rounding only).
    ref = reference_forward(x, params)
    assert jnp.allclose(out, ref, atol=5e-2, rtol=5e-2), "mismatch vs f32 reference"

    print("KERNEL_OK")
</pallas_src>

<mosaic_0001>
module attributes {stable_mosaic.version = 11 : i64} {
  func.func @dqn_mlp_kernel(%arg0: i32, %arg1: memref<128x16xbf16, #tpu.memory_space<vmem>>, %arg2: memref<16x128xbf16, #tpu.memory_space<vmem>>, %arg3: memref<1x128xf32, #tpu.memory_space<vmem>>, %arg4: memref<128x128xbf16, #tpu.memory_space<vmem>>, %arg5: memref<1x128xf32, #tpu.memory_space<vmem>>, %arg6: memref<128x128xbf16, #tpu.memory_space<vmem>>, %arg7: memref<1x128xf32, #tpu.memory_space<vmem>>, %arg8: memref<128x128xf32, #tpu.memory_space<vmem>>) attributes {dimension_semantics = [#tpu.dimension_semantics<parallel>], iteration_bounds = array<i64: 1>, scalar_prefetch = 0 : i64, scratch_operands = 0 : i64, tpu.core_type = #tpu.core_type<tc>, window_params = [{transform_indices = @transform_0, window_bounds = array<i64: 128, 16>}, {pipeline_mode = #tpu.pipeline_mode<synchronous>, transform_indices = @transform_1, window_bounds = array<i64: 16, 128>}, {pipeline_mode = #tpu.pipeline_mode<synchronous>, transform_indices = @transform_2, window_bounds = array<i64: 1, 128>}, {pipeline_mode = #tpu.pipeline_mode<synchronous>, transform_indices = @transform_3, window_bounds = array<i64: 128, 128>}, {pipeline_mode = #tpu.pipeline_mode<synchronous>, transform_indices = @transform_4, window_bounds = array<i64: 1, 128>}, {pipeline_mode = #tpu.pipeline_mode<synchronous>, transform_indices = @transform_5, window_bounds = array<i64: 128, 128>}, {pipeline_mode = #tpu.pipeline_mode<synchronous>, transform_indices = @transform_6, window_bounds = array<i64: 1, 128>}, {transform_indices = @transform_7, window_bounds = array<i64: 128, 128>}]} {
    %c0 = arith.constant 0 : index
    %c0_0 = arith.constant 0 : index
    %0 = vector.load %arg1[%c0, %c0_0] : memref<128x16xbf16, #tpu.memory_space<vmem>>, vector<128x16xbf16>
    %c0_1 = arith.constant 0 : index
    %c0_2 = arith.constant 0 : index
    %1 = vector.load %arg2[%c0_1, %c0_2] : memref<16x128xbf16, #tpu.memory_space<vmem>>, vector<16x128xbf16>
    %cst = arith.constant dense<0.000000e+00> : vector<128x128xf32>
    %2 = tpu.matmul %0, %1, %cst {dimension_numbers = #tpu.dot_dimension_numbers<[1], [0], [0], [1], [0, 0, 1, 1], [], []>} : vector<128x16xbf16>, vector<16x128xbf16>, vector<128x128xf32> -> vector<128x128xf32>
    %c0_3 = arith.constant 0 : index
    %c0_4 = arith.constant 0 : index
    %3 = vector.load %arg3[%c0_3, %c0_4] : memref<1x128xf32, #tpu.memory_space<vmem>>, vector<1x128xf32>
    %4 = vector.broadcast %3 : vector<1x128xf32> to vector<128x128xf32>
    %5 = arith.addf %2, %4 : vector<128x128xf32>
    %cst_5 = arith.constant 0.000000e+00 : f32
    %6 = vector.broadcast %cst_5 : f32 to vector<128x128xf32>
    %7 = arith.maximumf %5, %6 : vector<128x128xf32>
    %8 = arith.truncf %7 : vector<128x128xf32> to vector<128x128xbf16>
    %c0_6 = arith.constant 0 : index
    %c0_7 = arith.constant 0 : index
    %9 = vector.load %arg4[%c0_6, %c0_7] : memref<128x128xbf16, #tpu.memory_space<vmem>>, vector<128x128xbf16>
    %cst_8 = arith.constant dense<0.000000e+00> : vector<128x128xf32>
    %10 = tpu.matmul %8, %9, %cst_8 {dimension_numbers = #tpu.dot_dimension_numbers<[1], [0], [0], [1], [0, 0, 1, 1], [], []>} : vector<128x128xbf16>, vector<128x128xbf16>, vector<128x128xf32> -> vector<128x128xf32>
    %c0_9 = arith.constant 0 : index
    %c0_10 = arith.constant 0 : index
    %11 = vector.load %arg5[%c0_9, %c0_10] : memref<1x128xf32, #tpu.memory_space<vmem>>, vector<1x128xf32>
    %12 = vector.broadcast %11 : vector<1x128xf32> to vector<128x128xf32>
    %13 = arith.addf %10, %12 : vector<128x128xf32>
    %cst_11 = arith.constant 0.000000e+00 : f32
    %14 = vector.broadcast %cst_11 : f32 to vector<128x128xf32>
    %15 = arith.maximumf %13, %14 : vector<128x128xf32>
    %16 = arith.truncf %15 : vector<128x128xf32> to vector<128x128xbf16>
    %c0_12 = arith.constant 0 : index
    %c0_13 = arith.constant 0 : index
    %17 = vector.load %arg6[%c0_12, %c0_13] : memref<128x128xbf16, #tpu.memory_space<vmem>>, vector<128x128xbf16>
    %cst_14 = arith.constant dense<0.000000e+00> : vector<128x128xf32>
    %18 = tpu.matmul %16, %17, %cst_14 {dimension_numbers = #tpu.dot_dimension_numbers<[1], [0], [0], [1], [0, 0, 1, 1], [], []>} : vector<128x128xbf16>, vector<128x128xbf16>, vector<128x128xf32> -> vector<128x128xf32>
    %c0_15 = arith.constant 0 : index
    %c0_16 = arith.constant 0 : index
    %19 = vector.load %arg7[%c0_15, %c0_16] : memref<1x128xf32, #tpu.memory_space<vmem>>, vector<1x128xf32>
    %20 = vector.broadcast %19 : vector<1x128xf32> to vector<128x128xf32>
    %21 = arith.addf %18, %20 : vector<128x128xf32>
    %c0_17 = arith.constant 0 : index
    %c0_18 = arith.constant 0 : index
    %22 = vector.load %arg8[%c0_17, %c0_18] : memref<128x128xf32, #tpu.memory_space<vmem>>, vector<128x128xf32>
    tpu.vector_store %arg8[%c0_17, %c0_18], %21 {strides = array<i32>} : memref<128x128xf32, #tpu.memory_space<vmem>>, vector<128x128xf32>,
    return
  }
  func.func @transform_0(%arg0: i32) -> (i32, i32) {
    %c0_i32 = arith.constant 0 : i32
    %c0_i32_0 = arith.constant 0 : i32
    return %arg0, %c0_i32 : i32, i32
  }
  func.func @transform_1(%arg0: i32) -> (i32, i32) {
    %c0_i32 = arith.constant 0 : i32
    %c0_i32_0 = arith.constant 0 : i32
    %c0_i32_1 = arith.constant 0 : i32
    return %c0_i32, %c0_i32_0 : i32, i32
  }
  func.func @transform_2(%arg0: i32) -> (i32, i32) {
    %c0_i32 = arith.constant 0 : i32
    %c0_i32_0 = arith.constant 0 : i32
    %c0_i32_1 = arith.constant 0 : i32
    return %c0_i32, %c0_i32_0 : i32, i32
  }
  func.func @transform_3(%arg0: i32) -> (i32, i32) {
    %c0_i32 = arith.constant 0 : i32
    %c0_i32_0 = arith.constant 0 : i32
    %c0_i32_1 = arith.constant 0 : i32
    return %c0_i32, %c0_i32_0 : i32, i32
  }
  func.func @transform_4(%arg0: i32) -> (i32, i32) {
    %c0_i32 = arith.constant 0 : i32
    %c0_i32_0 = arith.constant 0 : i32
    %c0_i32_1 = arith.constant 0 : i32
    return %c0_i32, %c0_i32_0 : i32, i32
  }
  func.func @transform_5(%arg0: i32) -> (i32, i32) {
    %c0_i32 = arith.constant 0 : i32
    %c0_i32_0 = arith.constant 0 : i32
    %c0_i32_1 = arith.constant 0 : i32
    return %c0_i32, %c0_i32_0 : i32, i32
  }
  func.func @transform_6(%arg0: i32) -> (i32, i32) {
    %c0_i32 = arith.constant 0 : i32
    %c0_i32_0 = arith.constant 0 : i32
    %c0_i32_1 = arith.constant 0 : i32
    return %c0_i32, %c0_i32_0 : i32, i32
  }
  func.func @transform_7(%arg0: i32) -> (i32, i32) {
    %c0_i32 = arith.constant 0 : i32
    %c0_i32_0 = arith.constant 0 : i32
    return %arg0, %c0_i32 : i32, i32
  }
}

</mosaic_0001>

<bundles_post_ra>
// kernel: tpu_custom_call.1
= control target key start
LH: loop header
LB: loop body
LE: loop exit
PB: predicated region body
PF: predicated region fallthrough
CT: control target
= control target key end

     0   :  { %12 = vsyncpa [#allocation3], 0  ;;  %s1028_s0 = inlined_call_operand.vmem [shape: bf16[128,16], index: 0, kind: input, shape index: {}]   ;;  %s1029_s1 = inlined_call_operand.vmem [shape: bf16[16,128], index: 1, kind: input, shape index: {}]   ;;  %s1030_s2 = inlined_call_operand.vmem [shape: f32[1,128], index: 2, kind: input, shape index: {}]   ;;  %s1031_s3 = inlined_call_operand.vmem [shape: bf16[128,128], index: 3, kind: input, shape index: {}]   ;;  %s1032_s4 = inlined_call_operand.vmem [shape: f32[1,128], index: 4, kind: input, shape index: {}]   ;;  %s1033_s5 = inlined_call_operand.hbm [shape: bf16[128,128], index: 5, kind: input, shape index: {}]   ;;  %s1034_s6 = inlined_call_operand.vmem [shape: f32[1,128], index: 6, kind: input, shape index: {}]   ;;  %s1035_s7 = inlined_call_operand.hbm [shape: f32[128,128], index: 7, kind: output, shape index: {}]  }
   0x1   :  { %13 = vsyncpa [#allocation4], 0  ;;  %s890_s24 = smov [#allocation2]   ;;  %s842_s28 = scalar_lea.hbm %s1033_s5, 1024 }
   0x2   :  { %s29_s25 = sshll.u32 %s890_s24, 4  ;;  %p843_p0 = scmp.ne.s32.totalorder %s1033_s5, %s842_s28  ;;  %s30_s25 = int_to_ptr.vmem [resolvable:$true] %s29_s25 }
   0x3   :  { %p846_p1 = scmp.lt.u32.totalorder %s842_s28, %s1033_s5 }
   0x5   :  { %p848_p2 = pnand %p846_p1, %p843_p0 }
   0x7   :  { %851 = shalt.err (!%p848_p2)
}
   0x8   :  { %s852_s10 = scalar_lea.vmem %s30_s25, 1024  ;;  %p857_p4 = scmp.lt.s32.totalorder %s30_s25, %s30_s25 }
   0x9   :  { %p853_p3 = scmp.ne.s32.totalorder %s30_s25, %s852_s10  ;;  %p858_p5 = scmp.lt.s32.totalorder %s852_s10, %s852_s10 }
   0xb   :  { %p859_p6 = por %p858_p5, %p857_p4 }
   0xd   :  { %p860_p7 = pnand %p859_p6, %p853_p3 }
   0xf   :  { %863 = shalt.err (!%p860_p7)
}
  0x10   :  { %s891_s11 = smov 64   ;;  %s892_s12 = smov 4  }
  0x11   :  { %35 = dma.hbm_to_vmem [thread:$0]  %s1033_s5, 1024, %s30_s25, [#allocation3], %s891_s11, %s891_s11, %s892_s12  }
  0x12   :  { %886 = dma.done.wait [#allocation3], 1024  }
  0x13   :  { %887 = vsyncadd [#allocation3], 4294966272  ;;  %v817_v0 = vld [vmem:[%s1029_s1] sm:$0xff]   ;;  %vm113_vm0 = vcmask 130048   ;;  %v819_v2 = vld [vmem:[%s1028_s0 + $0x8] sm:$0xff]  }
  0x14   :  { %v818_v1 = vld [vmem:[%s1028_s0] sm:$0xff]   ;;  %729 = vmatprep.subr.bf16.mxu0 %v817_v0  ;;  %v820_v3 = vld [vmem:[%s1028_s0 + $0x10] sm:$0xff]   ;;  %v821_v4 = vld [vmem:[%s1028_s0 + $0x18] sm:$0xff]  }
  0x15   :  { %730 = vmatpush3.bf16.msra.mxu0 %v817_v0  ;;  %731 = vmatprep.mubr.msk.bf16.mxu0 %vm113_vm0, %v818_v1  ;;  %v826_v5 = vld [vmem:[%s1031_s3] sm:$0xff]   ;;  %v827_v6 = vld [vmem:[%s1031_s3 + $0x8] sm:$0xff]   ;;  %v828_v8 = vld [vmem:[%s1031_s3 + $0x10] sm:$0xff]  }
  0x16   :  { %v822_v7 = vld [vmem:[%s1028_s0 + $0x20] sm:$0xff]   ;;  %747 = vmatprep.subr.bf16.mxu1 %v826_v5  ;;  %v829_v9 = vld [vmem:[%s1031_s3 + $0x18] sm:$0xff]   ;;  %v823_v10 = vld [vmem:[%s1028_s0 + $0x28] sm:$0xff]  }
  0x17   :  { %748 = vmatpush3.bf16.msra.mxu1 %v826_v5  ;;  %v824_v11 = vld [vmem:[%s1028_s0 + $0x30] sm:$0xff]   ;;  %v830_v12 = vld [vmem:[%s1031_s3 + $0x20] sm:$0xff]   ;;  %v831_v13 = vld [vmem:[%s1031_s3 + $0x28] sm:$0xff]  }
  0x18   :  { %732 = vmatmul.mubr.msk.bf16.vlgmr.msra.gmra.mrb[0].mxu0 %vm113_vm0, %v819_v2  ;;  %749 = vmatprep.subr.bf16.mxu1 %v827_v6  ;;  %v825_v14 = vld [vmem:[%s1028_s0 + $0x38] sm:$0xff]   ;;  %v832_v15 = vld [vmem:[%s1031_s3 + $0x30] sm:$0xff]   ;;  %v834_v17 = vld [vmem:[#allocation2] sm:$0xff]  }
  0x19   :  { %735 = vmatprep.mubr.msk.bf16.mxu0 %vm113_vm0, %v820_v3  ;;  %v833_v16 = vld [vmem:[%s1031_s3 + $0x38] sm:$0xff]   ;;  %v835_v18 = vld [vmem:[#allocation2 + $0x8] sm:$0xff]   ;;  %779 = vmatprep.subr.bf16.mxu0 %v834_v17  ;;  %v836_v19 = vld [vmem:[#allocation2 + $0x10] sm:$0xff]  }
  0x1a   :  { %780 = vmatpush3.bf16.msra.mxu0 %v834_v17  ;;  %v837_v20 = vld [vmem:[#allocation2 + $0x18] sm:$0xff]   ;;  %v838_v21 = vld [vmem:[#allocation2 + $0x20] sm:$0xff]   ;;  %v839_v22 = vld [vmem:[#allocation2 + $0x28] sm:$0xff]  }
  0x1b   :  { %750 = vmatpush3.bf16.msra.mxu1 %v827_v6  ;;  %781 = vmatprep.subr.bf16.mxu0 %v835_v18  ;;  %v652_v23 = vld [vmem:[%s1030_s2] ss:$0 sm:$0xff]  ;;  %v841_v17 = vld [vmem:[#allocation2 + $0x38] sm:$0xff]  }
  0x1c   :  { %751 = vmatprep.subr.bf16.mxu1 %v828_v8 }
  0x1e   :  { %782 = vmatpush3.bf16.msra.mxu0 %v835_v18  ;;  %v670_v18 = vld [vmem:[%s1032_s4] ss:$0 sm:$0xff] }
  0x1f   :  { %752 = vmatpush3.bf16.msra.mxu1 %v828_v8  ;;  %783 = vmatprep.subr.bf16.mxu0 %v836_v19 }
  0x20   :  { %736 = vmatmul.mubr.msk.bf16.gmra.mrb[4].mxu0 %vm113_vm0, %v821_v4  ;;  %753 = vmatprep.subr.bf16.mxu1 %v829_v9 }
  0x21   :  { %739 = vmatprep.mubr.msk.bf16.mxu0 %vm113_vm0, %v822_v7 }
  0x22   :  { %784 = vmatpush3.bf16.msra.mxu0 %v836_v19 }
  0x23   :  { %754 = vmatpush3.bf16.msra.mxu1 %v829_v9  ;;  %785 = vmatprep.subr.bf16.mxu0 %v837_v20 }
  0x24   :  { %755 = vmatprep.subr.bf16.mxu1 %v830_v12 }
  0x26   :  { %786 = vmatpush3.bf16.msra.mxu0 %v837_v20 }
  0x27   :  { %756 = vmatpush3.bf16.msra.mxu1 %v830_v12  ;;  %787 = vmatprep.subr.bf16.mxu0 %v838_v21 }
  0x28   :  { %740 = vmatmul.mubr.msk.bf16.gmra.mrb[8].mxu0 %vm113_vm0, %v823_v10  ;;  %757 = vmatprep.subr.bf16.mxu1 %v831_v13 }
  0x29   :  { %743 = vmatprep.mubr.msk.bf16.mxu0 %vm113_vm0, %v824_v11 }
  0x2a   :  { %788 = vmatpush3.bf16.msra.mxu0 %v838_v21 }
  0x2b   :  { %758 = vmatpush3.bf16.msra.mxu1 %v831_v13  ;;  %789 = vmatprep.subr.bf16.mxu0 %v839_v22 }
  0x2c   :  { %759 = vmatprep.subr.bf16.mxu1 %v832_v15 }
  0x2e   :  { %790 = vmatpush3.bf16.msra.mxu0 %v839_v22 }
  0x2f   :  { %760 = vmatpush3.bf16.msra.mxu1 %v832_v15 }
  0x30   :  { %744 = vmatmul.mubr.msk.bf16.gmra.mrb[12].mxu0 %vm113_vm0, %v825_v14  ;;  %761 = vmatprep.subr.bf16.mxu1 %v833_v16 }
  0x33   :  { %762 = vmatpush3.bf16.msra.mxu1 %v833_v16  ;;  %v840_v16 = vld [vmem:[#allocation2 + $0x30] sm:$0xff]  }
  0x34   :  { %791 = vmatprep.subr.bf16.mxu0 %v840_v16 }
  0x35   :  { %792 = vmatpush3.bf16.msra.mxu0 %v840_v16 }
  0x36   :  { %793 = vmatprep.subr.bf16.mxu0 %v841_v17 }
  0x39   :  { %794 = vmatpush3.bf16.msra.mxu0 %v841_v17 }
  0xeb   :  { %v733_v24 = vpop.f32.mrb[0].mxu0 }
  0xec   :  { %v181_v25 = vadd.f32 %v733_v24, %v652_v23  ;;  %v172_v26 = vpop.f32.mrb[1].mxu0 }
  0xed   :  { %v173_v27 = vadd.f32 %v652_v23, %v172_v26  ;;  %v734_v28 = vpop.f32.mrb[2].mxu0 }
  0xee   :  { %v184_v29 = vadd.f32 %v734_v28, %v652_v23  ;;  %v175_v30 = vpop.f32.mrb[3].mxu0  ;;  %v237_v32 = vmax.f32 %v181_v25, 0.0 }
  0xef   :  { %v176_v31 = vadd.f32 %v652_v23, %v175_v30  ;;  %v235_v34 = vmax.f32 %v173_v27, 0.0 }
  0xf0   :  { %v238_v33 = vmax.f32 %v184_v29, 0.0 }
  0xf1   :  { %v236_v35 = vmax.f32 %v176_v31, 0.0 }
  0xf2   :  { %v252_v36 = vpack.c.bf16 %v238_v33, %v237_v32 }
  0xf3   :  { %v737_v37 = vpop.f32.mrb[4].mxu0  ;;  %v251_v38 = vpack.c.bf16 %v236_v35, %v235_v34 }
  0xf4   :  { %v197_v39 = vadd.f32 %v737_v37, %v652_v23  ;;  %v188_v40 = vpop.f32.mrb[5].mxu0 }
  0xf5   :  { %v189_v41 = vadd.f32 %v652_v23, %v188_v40  ;;  %v738_v42 = vpop.f32.mrb[6].mxu0  ;;  %763 = vmatprep.mubr.bf16.mxu1 %v251_v38 }
  0xf6   :  { %v200_v43 = vadd.f32 %v738_v42, %v652_v23  ;;  %v191_v44 = vpop.f32.mrb[7].mxu0  ;;  %764 = vmatmul.mubr.bf16.vlgmr.msra.gmra.mrb[0].mxu1 %v252_v36  ;;  %v241_v46 = vmax.f32 %v197_v39, 0.0 }
  0xf7   :  { %v192_v45 = vadd.f32 %v652_v23, %v191_v44  ;;  %v239_v48 = vmax.f32 %v189_v41, 0.0 }
  0xf8   :  { %v242_v47 = vmax.f32 %v200_v43, 0.0 }
  0xf9   :  { %v240_v49 = vmax.f32 %v192_v45, 0.0 }
  0xfa   :  { %v254_v50 = vpack.c.bf16 %v242_v47, %v241_v46 }
  0xfb   :  { %v253_v51 = vpack.c.bf16 %v240_v49, %v239_v48  ;;  %v741_v52 = vpop.f32.mrb[8].mxu0 }
  0xfc   :  { %v213_v53 = vadd.f32 %v741_v52, %v652_v23  ;;  %v204_v54 = vpop.f32.mrb[9].mxu0 }
  0xfd   :  { %v205_v55 = vadd.f32 %v652_v23, %v204_v54  ;;  %v742_v56 = vpop.f32.mrb[10].mxu0  ;;  %767 = vmatprep.mubr.bf16.mxu1 %v253_v51 }
  0xfe   :  { %v216_v57 = vadd.f32 %v742_v56, %v652_v23  ;;  %v207_v58 = vpop.f32.mrb[11].mxu0  ;;  %768 = vmatmul.mubr.bf16.gmra.mrb[4].mxu1 %v254_v50  ;;  %v245_v60 = vmax.f32 %v213_v53, 0.0 }
  0xff   :  { %v208_v59 = vadd.f32 %v652_v23, %v207_v58  ;;  %v243_v62 = vmax.f32 %v205_v55, 0.0 }
 0x100   :  { %v246_v61 = vmax.f32 %v216_v57, 0.0 }
 0x101   :  { %v244_v63 = vmax.f32 %v208_v59, 0.0 }
 0x102   :  { %v256_v0 = vpack.c.bf16 %v246_v61, %v245_v60 }
 0x103   :  { %v255_v1 = vpack.c.bf16 %v244_v63, %v243_v62  ;;  %v745_v2 = vpop.f32.mrb[12].mxu0 }
 0x104   :  { %v229_v3 = vadd.f32 %v745_v2, %v652_v23  ;;  %v220_v4 = vpop.f32.mrb[13].mxu0 }
 0x105   :  { %v221_v5 = vadd.f32 %v652_v23, %v220_v4  ;;  %v746_v6 = vpop.f32.mrb[14].mxu0  ;;  %771 = vmatprep.mubr.bf16.mxu1 %v255_v1 }
 0x106   :  { %v232_v7 = vadd.f32 %v746_v6, %v652_v23  ;;  %v223_v8 = vpop.f32.mrb[15].mxu0  ;;  %772 = vmatmul.mubr.bf16.gmra.mrb[8].mxu1 %v256_v0  ;;  %v249_v10 = vmax.f32 %v229_v3, 0.0 }
 0x107   :  { %v224_v9 = vadd.f32 %v652_v23, %v223_v8  ;;  %v247_v12 = vmax.f32 %v221_v5, 0.0 }
 0x108   :  { %v250_v11 = vmax.f32 %v232_v7, 0.0 }
 0x109   :  { %v248_v13 = vmax.f32 %v224_v9, 0.0 }
 0x10a   :  { %v258_v14 = vpack.c.bf16 %v250_v11, %v249_v10  ;;  %v679_v11 = vld [vmem:[%s1034_s6] ss:$0 sm:$0xff]  ;;  %s893_s6 = smov [#allocation5]  }
 0x10b   :  { %v257_v15 = vpack.c.bf16 %v248_v13, %v247_v12  ;;  %s640_s24 = sshll.u32 %s893_s6, 4  ;;  %s641_s24 = int_to_ptr.vmem [resolvable:$true] %s640_s24 }
 0x10c   :  { %s864_s25 = scalar_lea.vmem %s641_s24, 2048  ;;  %p869_p9 = scmp.lt.s32.totalorder %s641_s24, %s641_s24 }
 0x10d   :  { %775 = vmatprep.mubr.bf16.mxu1 %v257_v15  ;;  %p865_p8 = scmp.ne.s32.totalorder %s641_s24, %s864_s25  ;;  %p870_p10 = scmp.lt.s32.totalorder %s864_s25, %s864_s25 }
 0x10e   :  { %776 = vmatmul.mubr.bf16.gmra.mrb[12].mxu1 %v258_v14 }
 0x10f   :  { %p871_p11 = por %p870_p10, %p869_p9 }
 0x111   :  { %p872_p12 = pnand %p871_p11, %p865_p8 }
 0x1c9   :  { %v765_v19 = vpop.f32.mrb[0].mxu1 }
 0x1ca   :  { %v373_v20 = vadd.f32 %v765_v19, %v670_v18  ;;  %v364_v21 = vpop.f32.mrb[1].mxu1 }
 0x1cb   :  { %v365_v22 = vadd.f32 %v670_v18, %v364_v21  ;;  %v766_v23 = vpop.f32.mrb[2].mxu1 }
 0x1cc   :  { %v376_v24 = vadd.f32 %v766_v23, %v670_v18  ;;  %v367_v25 = vpop.f32.mrb[3].mxu1  ;;  %v429_v27 = vmax.f32 %v373_v20, 0.0 }
 0x1cd   :  { %v368_v26 = vadd.f32 %v670_v18, %v367_v25  ;;  %v427_v29 = vmax.f32 %v365_v22, 0.0 }
 0x1ce   :  { %v430_v28 = vmax.f32 %v376_v24, 0.0 }
 0x1cf   :  { %v428_v30 = vmax.f32 %v368_v26, 0.0 }
 0x1d0   :  { %v444_v31 = vpack.c.bf16 %v430_v28, %v429_v27 }
 0x1d1   :  { %v443_v32 = vpack.c.bf16 %v428_v30, %v427_v29  ;;  %v769_v33 = vpop.f32.mrb[4].mxu1 }
 0x1d2   :  { %v389_v34 = vadd.f32 %v769_v33, %v670_v18  ;;  %v380_v35 = vpop.f32.mrb[5].mxu1 }
 0x1d3   :  { %v381_v36 = vadd.f32 %v670_v18, %v380_v35  ;;  %v770_v37 = vpop.f32.mrb[6].mxu1  ;;  %795 = vmatprep.mubr.bf16.mxu0 %v443_v32 }
 0x1d4   :  { %v392_v38 = vadd.f32 %v770_v37, %v670_v18  ;;  %v383_v39 = vpop.f32.mrb[7].mxu1  ;;  %796 = vmatmul.mubr.bf16.vlgmr.msra.gmra.mrb[16].mxu0 %v444_v31  ;;  %v433_v41 = vmax.f32 %v389_v34, 0.0 }
 0x1d5   :  { %v384_v40 = vadd.f32 %v670_v18, %v383_v39  ;;  %v431_v43 = vmax.f32 %v381_v36, 0.0 }
 0x1d6   :  { %v434_v42 = vmax.f32 %v392_v38, 0.0 }
 0x1d7   :  { %v432_v44 = vmax.f32 %v384_v40, 0.0 }
 0x1d8   :  { %v446_v45 = vpack.c.bf16 %v434_v42, %v433_v41 }
 0x1d9   :  { %v445_v46 = vpack.c.bf16 %v432_v44, %v431_v43  ;;  %v773_v47 = vpop.f32.mrb[8].mxu1 }
 0x1da   :  { %v405_v48 = vadd.f32 %v773_v47, %v670_v18  ;;  %v396_v49 = vpop.f32.mrb[9].mxu1 }
 0x1db   :  { %v397_v50 = vadd.f32 %v670_v18, %v396_v49  ;;  %v774_v51 = vpop.f32.mrb[10].mxu1  ;;  %799 = vmatprep.mubr.bf16.mxu0 %v445_v46 }
 0x1dc   :  { %v408_v52 = vadd.f32 %v774_v51, %v670_v18  ;;  %v399_v53 = vpop.f32.mrb[11].mxu1  ;;  %800 = vmatmul.mubr.bf16.gmra.mrb[20].mxu0 %v446_v45  ;;  %v437_v55 = vmax.f32 %v405_v48, 0.0 }
 0x1dd   :  { %v400_v54 = vadd.f32 %v670_v18, %v399_v53  ;;  %v435_v57 = vmax.f32 %v397_v50, 0.0 }
 0x1de   :  { %v438_v56 = vmax.f32 %v408_v52, 0.0 }
 0x1df   :  { %v436_v58 = vmax.f32 %v400_v54, 0.0 }
 0x1e0   :  { %v448_v59 = vpack.c.bf16 %v438_v56, %v437_v55 }
 0x1e1   :  { %v447_v60 = vpack.c.bf16 %v436_v58, %v435_v57  ;;  %v777_v61 = vpop.f32.mrb[12].mxu1 }
 0x1e2   :  { %v421_v62 = vadd.f32 %v777_v61, %v670_v18  ;;  %v412_v63 = vpop.f32.mrb[13].mxu1 }
 0x1e3   :  { %v413_v0 = vadd.f32 %v670_v18, %v412_v63  ;;  %v778_v1 = vpop.f32.mrb[14].mxu1  ;;  %803 = vmatprep.mubr.bf16.mxu0 %v447_v60 }
 0x1e4   :  { %v424_v2 = vadd.f32 %v778_v1, %v670_v18  ;;  %v415_v3 = vpop.f32.mrb[15].mxu1  ;;  %804 = vmatmul.mubr.bf16.gmra.mrb[24].mxu0 %v448_v59  ;;  %v441_v5 = vmax.f32 %v421_v62, 0.0 }
 0x1e5   :  { %v416_v4 = vadd.f32 %v670_v18, %v415_v3  ;;  %v439_v7 = vmax.f32 %v413_v0, 0.0 }
 0x1e6   :  { %v442_v6 = vmax.f32 %v424_v2, 0.0 }
 0x1e7   :  { %v440_v8 = vmax.f32 %v416_v4, 0.0 }
 0x1e8   :  { %v450_v9 = vpack.c.bf16 %v442_v6, %v441_v5 }
 0x1e9   :  { %v449_v10 = vpack.c.bf16 %v440_v8, %v439_v7 }
 0x1eb   :  { %807 = vmatprep.mubr.bf16.mxu0 %v449_v10 }
 0x1ec   :  { %808 = vmatmul.mubr.bf16.gmra.mrb[28].mxu0 %v450_v9 }
 0x2a7   :  { %v797_v12 = vpop.f32.mrb[16].mxu0 }
 0x2a8   :  { %v565_v13 = vadd.f32 %v797_v12, %v679_v11  ;;  %v556_v14 = vpop.f32.mrb[17].mxu0 }
 0x2a9   :  { %v557_v15 = vadd.f32 %v679_v11, %v556_v14  ;;  %v798_v16 = vpop.f32.mrb[18].mxu0 }
 0x2aa   :  { %621 = vst [vmem:[#allocation5 + $0x10] sm:$0xff] %v565_v13  ;;  %v568_v17 = vadd.f32 %v798_v16, %v679_v11  ;;  %v559_v18 = vpop.f32.mrb[19].mxu0 }
 0x2ab   :  { %619 = vst [vmem:[#allocation5] sm:$0xff] %v557_v15  ;;  %v560_v19 = vadd.f32 %v679_v11, %v559_v18 }
 0x2ac   :  { %622 = vst [vmem:[#allocation5 + $0x18] sm:$0xff] %v568_v17 }
 0x2ad   :  { %620 = vst [vmem:[#allocation5 + $0x8] sm:$0xff] %v560_v19 }
 0x2af   :  { %v801_v20 = vpop.f32.mrb[20].mxu0 }
 0x2b0   :  { %v581_v21 = vadd.f32 %v801_v20, %v679_v11  ;;  %v572_v22 = vpop.f32.mrb[21].mxu0 }
 0x2b1   :  { %v573_v23 = vadd.f32 %v679_v11, %v572_v22  ;;  %v802_v24 = vpop.f32.mrb[22].mxu0 }
 0x2b2   :  { %625 = vst [vmem:[#allocation5 + $0x30] sm:$0xff] %v581_v21  ;;  %v584_v25 = vadd.f32 %v802_v24, %v679_v11  ;;  %v575_v26 = vpop.f32.mrb[23].mxu0 }
 0x2b3   :  { %623 = vst [vmem:[#allocation5 + $0x20] sm:$0xff] %v573_v23  ;;  %v576_v27 = vadd.f32 %v679_v11, %v575_v26 }
 0x2b4   :  { %626 = vst [vmem:[#allocation5 + $0x38] sm:$0xff] %v584_v25 }
 0x2b5   :  { %624 = vst [vmem:[#allocation5 + $0x28] sm:$0xff] %v576_v27 }
 0x2b7   :  { %v805_v28 = vpop.f32.mrb[24].mxu0 }
 0x2b8   :  { %v597_v29 = vadd.f32 %v805_v28, %v679_v11  ;;  %v588_v30 = vpop.f32.mrb[25].mxu0 }
 0x2b9   :  { %v589_v31 = vadd.f32 %v679_v11, %v588_v30  ;;  %v806_v32 = vpop.f32.mrb[26].mxu0 }
 0x2ba   :  { %629 = vst [vmem:[#allocation5 + $0x50] sm:$0xff] %v597_v29  ;;  %v600_v33 = vadd.f32 %v806_v32, %v679_v11  ;;  %v591_v34 = vpop.f32.mrb[27].mxu0 }
 0x2bb   :  { %627 = vst [vmem:[#allocation5 + $0x40] sm:$0xff] %v589_v31  ;;  %v592_v35 = vadd.f32 %v679_v11, %v591_v34 }
 0x2bc   :  { %630 = vst [vmem:[#allocation5 + $0x58] sm:$0xff] %v600_v33 }
 0x2bd   :  { %628 = vst [vmem:[#allocation5 + $0x48] sm:$0xff] %v592_v35 }
 0x2bf   :  { %v809_v36 = vpop.f32.mrb[28].mxu0 }
 0x2c0   :  { %v613_v37 = vadd.f32 %v809_v36, %v679_v11  ;;  %v604_v38 = vpop.f32.mrb[29].mxu0 }
 0x2c1   :  { %v605_v39 = vadd.f32 %v679_v11, %v604_v38  ;;  %v810_v40 = vpop.f32.mrb[30].mxu0 }
 0x2c2   :  { %633 = vst [vmem:[#allocation5 + $0x70] sm:$0xff] %v613_v37  ;;  %v616_v41 = vadd.f32 %v810_v40, %v679_v11  ;;  %v607_v42 = vpop.f32.mrb[31].mxu0 }
 0x2c3   :  { %631 = vst [vmem:[#allocation5 + $0x60] sm:$0xff] %v605_v39  ;;  %v608_v43 = vadd.f32 %v679_v11, %v607_v42 }
 0x2c4   :  { %634 = vst [vmem:[#allocation5 + $0x78] sm:$0xff] %v616_v41 }
 0x2c5   :  { %632 = vst [vmem:[#allocation5 + $0x68] sm:$0xff] %v608_v43 }
 0x2c6   :  { %875 = shalt.err (!%p872_p12)
}
 0x2c7   :  { %s876_s28 = scalar_lea.hbm %s1035_s7, 2048 }
 0x2c8   :  { %p877_p13 = scmp.ne.s32.totalorder %s1035_s7, %s876_s28  ;;  %p880_p0 = scmp.lt.u32.totalorder %s876_s28, %s1035_s7 }
 0x2ca   :  { %p882_p1 = pnand %p880_p0, %p877_p13 }
 0x2cc   :  { %885 = shalt.err (!%p882_p1)
}
 0x2cd   :  { %s894_s10 = smov 128   ;;  %s895_s11 = smov 8  }
 0x2ce   :  { %646 = dma.vmem_to_hbm [thread:$0]  %s641_s24, 2048, %s1035_s7, [#allocation4], %s894_s10, %s894_s10, %s895_s11  }
 0x2cf   :  { %888 = dma.done.wait [#allocation4], 2048  }
 0x2d0   :  { %889 = vsyncadd [#allocation4], 4294965248 }
 0x2d1   :  { %650 = vsyncpa [#allocation3], 1 }
 0x2d2   :  { %651 = vsyncpa [#allocation4], 1 }

</bundles_post_ra>
